<compile_context>
chip_gen: v7x
topology: tpu7x:2x2x1
jax: 0.10.0
libtpu: 0.0.40
codegen_flags: <defaults>
</compile_context>

<pallas_src>
import functools
import math

import jax
import jax.numpy as jnp
from jax.experimental import pallas as pl
from jax.experimental.pallas import tpu as pltpu


# ----------------------------------------------------------------------------
# Pallas kernel: fused dual-domain conv (per-batch, per-tap MXU matmul + roll)
# ----------------------------------------------------------------------------
def _fused_conv_kernel(x_ref, w_ref, b_ref, o_ref, *, k_w, img_w):
    # x_ref: (C, L) bf16   w_ref: (T, C_out, C) bf16
    # b_ref: (C_out, 1) f32   o_ref: (C_out, L) f32,  L = H*W
    x = x_ref[...]
    L = o_ref.shape[-1]
    taps = w_ref.shape[0]
    acc = jnp.zeros(o_ref.shape, jnp.float32)
    for t in range(taps):                      # static unroll (KH*KW taps)
        kh, kw = divmod(t, k_w)
        s = kh * img_w + kw                    # static flat shift of this tap
        z = jnp.dot(w_ref[t], x, preferred_element_type=jnp.float32)
        if s:
            # out[p] needs z[p + s]; circular wrap only corrupts positions past
            # the valid OHxOW window, which the wrapper slices away.
            z = pltpu.roll(z, shift=L - s, axis=1)
        acc = acc + z
    o_ref[...] = acc + b_ref[...]


def fused_dual_conv2d(x_all, w_taps, bias, *, img_h, img_w, k_h, k_w):
    """x_all (N, C, H*W) bf16, w_taps (KH*KW, C_out, C) bf16, bias (C_out,1) f32
    -> valid conv output (N, C_out, OH, OW) float32 (stride 1, padding 0)."""
    N, C, L = x_all.shape
    T, C_out, _ = w_taps.shape
    assert L == img_h * img_w and T == k_h * k_w
    OH, OW = img_h - k_h + 1, img_w - k_w + 1

    kernel = functools.partial(_fused_conv_kernel, k_w=k_w, img_w=img_w)
    flops = 2 * N * T * C_out * C * L
    bytes_accessed = (x_all.size * x_all.dtype.itemsize
                      + w_taps.size * w_taps.dtype.itemsize
                      + bias.size * 4 + N * C_out * L * 4)

    out = pl.pallas_call(
        kernel,
        out_shape=jax.ShapeDtypeStruct((N, C_out, L), jnp.float32),
        grid=(N,),
        in_specs=[
            pl.BlockSpec((None, C, L), lambda n: (n, 0, 0)),       # one batch
            pl.BlockSpec((T, C_out, C), lambda n: (0, 0, 0)),      # all taps
            pl.BlockSpec((C_out, 1), lambda n: (0, 0)),            # bias
        ],
        out_specs=pl.BlockSpec((None, C_out, L), lambda n: (n, 0, 0)),
        compiler_params=pltpu.CompilerParams(
            dimension_semantics=("parallel",),          # megacore over batch
            vmem_limit_bytes=32 * 1024 * 1024),         # safe on v5e/v6e/v7x
        cost_estimate=pl.CostEstimate(
            flops=flops, transcendentals=0, bytes_accessed=bytes_accessed),
    )(x_all, w_taps, bias)

    return out.reshape(N, C_out, img_h, img_w)[:, :, :OH, :OW]


# ----------------------------------------------------------------------------
# Log-Gabor filter bank (tiny; plain JAX per perf review, matches PyTorch math)
# ----------------------------------------------------------------------------
def _loggabor_filter_bank(freq, theta, sigma, psi, f0, theta0, xg, yg):
    """freq/theta/sigma/psi: (O, I); xg/yg: (KH, KW) -> (O, I, KH, KW)."""
    delta = 0.001
    f = freq[:, :, None, None].astype(jnp.float32)
    t = theta[:, :, None, None].astype(jnp.float32)
    s = sigma[:, :, None, None].astype(jnp.float32)
    p = psi[:, :, None, None].astype(jnp.float32)
    x = xg[None, None, :, :].astype(jnp.float32)
    y = yg[None, None, :, :].astype(jnp.float32)

    cos_t, sin_t = jnp.cos(t), jnp.sin(t)                 # hoisted: (O,I,1,1)
    rotx = x * cos_t + y * sin_t
    roty = -x * sin_t + y * cos_t
    r = jnp.sqrt(rotx * rotx + roty * roty + delta)
    # Exactly matches the reference: the 2 sits inside the squared term.
    g_radial = jnp.exp(
        -((jnp.log(r) - jnp.log(f0)) / (2.0 * jnp.log(s / f0))) ** 2)
    g_angular = jnp.exp(-((t - theta0) ** 2) / (2.0 * s * s))   # (O,I,1,1)
    g = g_radial * g_angular
    g = g * jnp.cos(f * r + p)
    g = g / (2.0 * math.pi * s * s)
    return g


def _make_grids(k_h, k_w):
    x0 = math.ceil(k_h / 2)
    y0 = math.ceil(k_w / 2)
    a = jnp.linspace(-x0 + 1, x0 + 0, k_h, dtype=jnp.float32)
    b = jnp.linspace(-y0 + 1, y0 + 0, k_w, dtype=jnp.float32)
    yg, xg = jnp.meshgrid(a, b, indexing="ij")    # torch.meshgrid 'ij' default
    return xg, yg


# ----------------------------------------------------------------------------
# Parameter init (shapes/distributions match the PyTorch module)
# ----------------------------------------------------------------------------
def _init_loggabor(key, out_c, in_c):
    k1, k2, k3 = jax.random.split(key, 3)
    freq = (math.pi / 2) * (math.sqrt(2) ** (
        -jax.random.randint(k1, (out_c, in_c), 0, 5).astype(jnp.float32)))
    theta = (math.pi / 8) * jax.random.randint(k2, (out_c, in_c), 0, 8).astype(
        jnp.float32)
    sigma = math.pi / freq
    psi = math.pi * jax.random.uniform(k3, (out_c, in_c), dtype=jnp.float32)
    return dict(freq=freq, theta=theta, sigma=sigma, psi=psi,
                f0=jnp.float32(1.0), theta0=jnp.float32(1.0))


def init_params(key, in_channels, out_channels):
    k0, k1, k2, k3 = jax.random.split(key, 4)
    fan_in = out_channels * 2               # fusion is a 1x1 conv over 2*C_out
    bound = 1.0 / math.sqrt(fan_in)
    return {
        "freq_branch": _init_loggabor(k0, out_channels, in_channels * 2),
        "spatial_branch": _init_loggabor(k1, out_channels, in_channels),
        "fusion_w": jax.random.uniform(
            k2, (out_channels, out_channels * 2, 1, 1),
            minval=-bound, maxval=bound, dtype=jnp.float32),
        "fusion_b": jax.random.uniform(
            k3, (out_channels,), minval=-bound, maxval=bound,
            dtype=jnp.float32),
    }


# ----------------------------------------------------------------------------
# Forward pass of DualDomainLogGaborConv2d
# ----------------------------------------------------------------------------
@functools.partial(jax.jit, static_argnames=("kernel_size",))
def dual_domain_forward(params, x, *, kernel_size):
    k_h = k_w = kernel_size
    N, C_in, H, W = x.shape
    xg, yg = _make_grids(k_h, k_w)

    # Frequency-domain features (no Pallas FFT -> plain JAX, see TODO above).
    x_freq = jnp.fft.fftshift(jnp.fft.fft2(x))   # shifts ALL dims, like torch
    magnitude = jnp.abs(x_freq).astype(jnp.float32)
    phase = jnp.angle(x_freq).astype(jnp.float32)

    # Log-Gabor filter banks for both branches.
    fb, sb = params["freq_branch"], params["spatial_branch"]
    w_freq = _loggabor_filter_bank(fb["freq"], fb["theta"], fb["sigma"],
                                   fb["psi"], fb["f0"], fb["theta0"], xg, yg)
    w_sp = _loggabor_filter_bank(sb["freq"], sb["theta"], sb["sigma"],
                                 sb["psi"], sb["f0"], sb["theta0"], xg, yg)

    # Fold the 1x1 fusion conv into the branch weights (exact: branches have
    # bias=False and the fusion conv is linear over their outputs).
    C_out = w_sp.shape[0]
    fw = params["fusion_w"][:, :, 0, 0]                   # (C_out, 2*C_out)
    w_freq_fused = jnp.einsum("oc,cikl->oikl", fw[:, :C_out], w_freq)
    w_sp_fused = jnp.einsum("oc,cikl->oikl", fw[:, C_out:], w_sp)
    w_comb = jnp.concatenate([w_freq_fused, w_sp_fused], axis=1)
    w_taps = (w_comb.reshape(C_out, 3 * C_in, k_h * k_w)
              .transpose(2, 0, 1).astype(jnp.bfloat16))   # (T, C_out, 3*C_in)
    bias = params["fusion_b"].reshape(C_out, 1).astype(jnp.float32)

    # Single fused conv over [|F|, angle(F), x]; bf16 activations, f32 accum.
    x_all = jnp.concatenate(
        [magnitude.astype(jnp.bfloat16),
         phase.astype(jnp.bfloat16),
         x.astype(jnp.bfloat16)], axis=1).reshape(N, 3 * C_in, H * W)

    return fused_dual_conv2d(x_all, w_taps, bias,
                             img_h=H, img_w=W, k_h=k_h, k_w=k_w)


if __name__ == "__main__":
    key = jax.random.PRNGKey(0)
    kx, kp = jax.random.split(key)

    in_channels, out_channels, kernel_size = 4, 8, 3
    x = jax.random.normal(kx, (2, in_channels, 16, 16), dtype=jnp.float32)
    params = init_params(kp, in_channels, out_channels)

    y = dual_domain_forward(params, x, kernel_size=kernel_size)
    jax.block_until_ready(y)

    OH = OW = 16 - kernel_size + 1
    assert y.shape == (2, out_channels, OH, OW), y.shape
    assert bool(jnp.all(jnp.isfinite(y)))
    print("KERNEL_OK")
</pallas_src>

<mosaic_0001>
module attributes {stable_mosaic.version = 11 : i64} {
  func.func @_fused_conv_kernel(%arg0: i32, %arg1: memref<1x12x256xbf16, #tpu.memory_space<vmem>>, %arg2: memref<9x8x12xbf16, #tpu.memory_space<vmem>>, %arg3: memref<8x1xf32, #tpu.memory_space<vmem>>, %arg4: memref<1x8x256xf32, #tpu.memory_space<vmem>>) attributes {dimension_semantics = [#tpu.dimension_semantics<parallel>], iteration_bounds = array<i64: 2>, scalar_prefetch = 0 : i64, scratch_operands = 0 : i64, tpu.core_type = #tpu.core_type<tc>, window_params = [{transform_indices = @transform_0, window_bounds = array<i64: 1, 12, 256>}, {pipeline_mode = #tpu.pipeline_mode<synchronous>, transform_indices = @transform_1, window_bounds = array<i64: 9, 8, 12>}, {pipeline_mode = #tpu.pipeline_mode<synchronous>, transform_indices = @transform_2, window_bounds = array<i64: 8, 1>}, {transform_indices = @transform_3, window_bounds = array<i64: 1, 8, 256>}]} {
    %c0 = arith.constant 0 : index
    %c0_0 = arith.constant 0 : index
    %c0_1 = arith.constant 0 : index
    %0 = vector.load %arg1[%c0, %c0_0, %c0_1] : memref<1x12x256xbf16, #tpu.memory_space<vmem>>, vector<1x12x256xbf16>
    %1 = vector.shape_cast %0 : vector<1x12x256xbf16> to vector<12x256xbf16>
    %cst = arith.constant 0.000000e+00 : f32
    %2 = vector.broadcast %cst : f32 to vector<8x256xf32>
    %c0_2 = arith.constant 0 : index
    %c0_3 = arith.constant 0 : index
    %c0_4 = arith.constant 0 : index
    %3 = vector.load %arg2[%c0_2, %c0_3, %c0_4] : memref<9x8x12xbf16, #tpu.memory_space<vmem>>, vector<1x8x12xbf16>
    %4 = vector.shape_cast %3 : vector<1x8x12xbf16> to vector<8x12xbf16>
    %cst_5 = arith.constant dense<0.000000e+00> : vector<8x256xf32>
    %5 = tpu.matmul %4, %1, %cst_5 {dimension_numbers = #tpu.dot_dimension_numbers<[1], [0], [0], [1], [0, 0, 1, 1], [], []>} : vector<8x12xbf16>, vector<12x256xbf16>, vector<8x256xf32> -> vector<8x256xf32>
    %6 = arith.addf %2, %5 : vector<8x256xf32>
    %c1 = arith.constant 1 : index
    %c0_6 = arith.constant 0 : index
    %c0_7 = arith.constant 0 : index
    %7 = vector.load %arg2[%c1, %c0_6, %c0_7] : memref<9x8x12xbf16, #tpu.memory_space<vmem>>, vector<1x8x12xbf16>
    %8 = vector.shape_cast %7 : vector<1x8x12xbf16> to vector<8x12xbf16>
    %cst_8 = arith.constant dense<0.000000e+00> : vector<8x256xf32>
    %9 = tpu.matmul %8, %1, %cst_8 {dimension_numbers = #tpu.dot_dimension_numbers<[1], [0], [0], [1], [0, 0, 1, 1], [], []>} : vector<8x12xbf16>, vector<12x256xbf16>, vector<8x256xf32> -> vector<8x256xf32>
    %c255_i32 = arith.constant 255 : i32
    %10 = tpu.dynamic_rotate %9 by %c255_i32 dim 1 : vector<8x256xf32>, i32 -> vector<8x256xf32>
    %11 = arith.addf %6, %10 : vector<8x256xf32>
    %c2 = arith.constant 2 : index
    %c0_9 = arith.constant 0 : index
    %c0_10 = arith.constant 0 : index
    %12 = vector.load %arg2[%c2, %c0_9, %c0_10] : memref<9x8x12xbf16, #tpu.memory_space<vmem>>, vector<1x8x12xbf16>
    %13 = vector.shape_cast %12 : vector<1x8x12xbf16> to vector<8x12xbf16>
    %cst_11 = arith.constant dense<0.000000e+00> : vector<8x256xf32>
    %14 = tpu.matmul %13, %1, %cst_11 {dimension_numbers = #tpu.dot_dimension_numbers<[1], [0], [0], [1], [0, 0, 1, 1], [], []>} : vector<8x12xbf16>, vector<12x256xbf16>, vector<8x256xf32> -> vector<8x256xf32>
    %c254_i32 = arith.constant 254 : i32
    %15 = tpu.dynamic_rotate %14 by %c254_i32 dim 1 : vector<8x256xf32>, i32 -> vector<8x256xf32>
    %16 = arith.addf %11, %15 : vector<8x256xf32>
    %c3 = arith.constant 3 : index
    %c0_12 = arith.constant 0 : index
    %c0_13 = arith.constant 0 : index
    %17 = vector.load %arg2[%c3, %c0_12, %c0_13] : memref<9x8x12xbf16, #tpu.memory_space<vmem>>, vector<1x8x12xbf16>
    %18 = vector.shape_cast %17 : vector<1x8x12xbf16> to vector<8x12xbf16>
    %cst_14 = arith.constant dense<0.000000e+00> : vector<8x256xf32>
    %19 = tpu.matmul %18, %1, %cst_14 {dimension_numbers = #tpu.dot_dimension_numbers<[1], [0], [0], [1], [0, 0, 1, 1], [], []>} : vector<8x12xbf16>, vector<12x256xbf16>, vector<8x256xf32> -> vector<8x256xf32>
    %c240_i32 = arith.constant 240 : i32
    %20 = tpu.dynamic_rotate %19 by %c240_i32 dim 1 : vector<8x256xf32>, i32 -> vector<8x256xf32>
    %21 = arith.addf %16, %20 : vector<8x256xf32>
    %c4 = arith.constant 4 : index
    %c0_15 = arith.constant 0 : index
    %c0_16 = arith.constant 0 : index
    %22 = vector.load %arg2[%c4, %c0_15, %c0_16] : memref<9x8x12xbf16, #tpu.memory_space<vmem>>, vector<1x8x12xbf16>
    %23 = vector.shape_cast %22 : vector<1x8x12xbf16> to vector<8x12xbf16>
    %cst_17 = arith.constant dense<0.000000e+00> : vector<8x256xf32>
    %24 = tpu.matmul %23, %1, %cst_17 {dimension_numbers = #tpu.dot_dimension_numbers<[1], [0], [0], [1], [0, 0, 1, 1], [], []>} : vector<8x12xbf16>, vector<12x256xbf16>, vector<8x256xf32> -> vector<8x256xf32>
    %c239_i32 = arith.constant 239 : i32
    %25 = tpu.dynamic_rotate %24 by %c239_i32 dim 1 : vector<8x256xf32>, i32 -> vector<8x256xf32>
    %26 = arith.addf %21, %25 : vector<8x256xf32>
    %c5 = arith.constant 5 : index
    %c0_18 = arith.constant 0 : index
    %c0_19 = arith.constant 0 : index
    %27 = vector.load %arg2[%c5, %c0_18, %c0_19] : memref<9x8x12xbf16, #tpu.memory_space<vmem>>, vector<1x8x12xbf16>
    %28 = vector.shape_cast %27 : vector<1x8x12xbf16> to vector<8x12xbf16>
    %cst_20 = arith.constant dense<0.000000e+00> : vector<8x256xf32>
    %29 = tpu.matmul %28, %1, %cst_20 {dimension_numbers = #tpu.dot_dimension_numbers<[1], [0], [0], [1], [0, 0, 1, 1], [], []>} : vector<8x12xbf16>, vector<12x256xbf16>, vector<8x256xf32> -> vector<8x256xf32>
    %c238_i32 = arith.constant 238 : i32
    %30 = tpu.dynamic_rotate %29 by %c238_i32 dim 1 : vector<8x256xf32>, i32 -> vector<8x256xf32>
    %31 = arith.addf %26, %30 : vector<8x256xf32>
    %c6 = arith.constant 6 : index
    %c0_21 = arith.constant 0 : index
    %c0_22 = arith.constant 0 : index
    %32 = vector.load %arg2[%c6, %c0_21, %c0_22] : memref<9x8x12xbf16, #tpu.memory_space<vmem>>, vector<1x8x12xbf16>
    %33 = vector.shape_cast %32 : vector<1x8x12xbf16> to vector<8x12xbf16>
    %cst_23 = arith.constant dense<0.000000e+00> : vector<8x256xf32>
    %34 = tpu.matmul %33, %1, %cst_23 {dimension_numbers = #tpu.dot_dimension_numbers<[1], [0], [0], [1], [0, 0, 1, 1], [], []>} : vector<8x12xbf16>, vector<12x256xbf16>, vector<8x256xf32> -> vector<8x256xf32>
    %c224_i32 = arith.constant 224 : i32
    %35 = tpu.dynamic_rotate %34 by %c224_i32 dim 1 : vector<8x256xf32>, i32 -> vector<8x256xf32>
    %36 = arith.addf %31, %35 : vector<8x256xf32>
    %c7 = arith.constant 7 : index
    %c0_24 = arith.constant 0 : index
    %c0_25 = arith.constant 0 : index
    %37 = vector.load %arg2[%c7, %c0_24, %c0_25] : memref<9x8x12xbf16, #tpu.memory_space<vmem>>, vector<1x8x12xbf16>
    %38 = vector.shape_cast %37 : vector<1x8x12xbf16> to vector<8x12xbf16>
    %cst_26 = arith.constant dense<0.000000e+00> : vector<8x256xf32>
    %39 = tpu.matmul %38, %1, %cst_26 {dimension_numbers = #tpu.dot_dimension_numbers<[1], [0], [0], [1], [0, 0, 1, 1], [], []>} : vector<8x12xbf16>, vector<12x256xbf16>, vector<8x256xf32> -> vector<8x256xf32>
    %c223_i32 = arith.constant 223 : i32
    %40 = tpu.dynamic_rotate %39 by %c223_i32 dim 1 : vector<8x256xf32>, i32 -> vector<8x256xf32>
    %41 = arith.addf %36, %40 : vector<8x256xf32>
    %c8 = arith.constant 8 : index
    %c0_27 = arith.constant 0 : index
    %c0_28 = arith.constant 0 : index
    %42 = vector.load %arg2[%c8, %c0_27, %c0_28] : memref<9x8x12xbf16, #tpu.memory_space<vmem>>, vector<1x8x12xbf16>
    %43 = vector.shape_cast %42 : vector<1x8x12xbf16> to vector<8x12xbf16>
    %cst_29 = arith.constant dense<0.000000e+00> : vector<8x256xf32>
    %44 = tpu.matmul %43, %1, %cst_29 {dimension_numbers = #tpu.dot_dimension_numbers<[1], [0], [0], [1], [0, 0, 1, 1], [], []>} : vector<8x12xbf16>, vector<12x256xbf16>, vector<8x256xf32> -> vector<8x256xf32>
    %c222_i32 = arith.constant 222 : i32
    %45 = tpu.dynamic_rotate %44 by %c222_i32 dim 1 : vector<8x256xf32>, i32 -> vector<8x256xf32>
    %46 = arith.addf %41, %45 : vector<8x256xf32>
    %c0_30 = arith.constant 0 : index
    %c0_31 = arith.constant 0 : index
    %47 = vector.load %arg3[%c0_30, %c0_31] : memref<8x1xf32, #tpu.memory_space<vmem>>, vector<8x1xf32>
    %48 = vector.broadcast %47 : vector<8x1xf32> to vector<8x256xf32>
    %49 = arith.addf %46, %48 : vector<8x256xf32>
    %c0_32 = arith.constant 0 : index
    %c0_33 = arith.constant 0 : index
    %c0_34 = arith.constant 0 : index
    %50 = vector.load %arg4[%c0_32, %c0_33, %c0_34] : memref<1x8x256xf32, #tpu.memory_space<vmem>>, vector<1x8x256xf32>
    %51 = vector.shape_cast %50 : vector<1x8x256xf32> to vector<8x256xf32>
    %52 = vector.shape_cast %49 : vector<8x256xf32> to vector<1x8x256xf32>
    tpu.vector_store %arg4[%c0_32, %c0_33, %c0_34], %52 {strides = array<i32>} : memref<1x8x256xf32, #tpu.memory_space<vmem>>, vector<1x8x256xf32>,
    return
  }
  func.func @transform_0(%arg0: i32) -> (i32, i32, i32) {
    %c0_i32 = arith.constant 0 : i32
    %c0_i32_0 = arith.constant 0 : i32
    %c0_i32_1 = arith.constant 0 : i32
    return %arg0, %c0_i32, %c0_i32_0 : i32, i32, i32
  }
  func.func @transform_1(%arg0: i32) -> (i32, i32, i32) {
    %c0_i32 = arith.constant 0 : i32
    %c0_i32_0 = arith.constant 0 : i32
    %c0_i32_1 = arith.constant 0 : i32
    %c0_i32_2 = arith.constant 0 : i32
    return %c0_i32, %c0_i32_0, %c0_i32_1 : i32, i32, i32
  }
  func.func @transform_2(%arg0: i32) -> (i32, i32) {
    %c0_i32 = arith.constant 0 : i32
    %c0_i32_0 = arith.constant 0 : i32
    %c0_i32_1 = arith.constant 0 : i32
    return %c0_i32, %c0_i32_0 : i32, i32
  }
  func.func @transform_3(%arg0: i32) -> (i32, i32, i32) {
    %c0_i32 = arith.constant 0 : i32
    %c0_i32_0 = arith.constant 0 : i32
    %c0_i32_1 = arith.constant 0 : i32
    return %arg0, %c0_i32, %c0_i32_0 : i32, i32, i32
  }
}

</mosaic_0001>

<bundles_post_ra>
// kernel: dual_domain_forward.1
= control target key start
LH: loop header
LB: loop body
LE: loop exit
PB: predicated region body
PF: predicated region fallthrough
CT: control target
= control target key end

     0   :  { %s839_s12 = smov 0   ;;  %s918_s0 = inlined_call_operand.vmem [shape: bf16[2,12,256], index: 0, kind: input, shape index: {}]   ;;  %s919_s1 = inlined_call_operand.vmem [shape: bf16[9,8,12], index: 1, kind: input, shape index: {}]   ;;  %s920_s2 = inlined_call_operand.vmem [shape: f32[8,1], index: 2, kind: input, shape index: {}]   ;;  %s921_s3 = inlined_call_operand.vmem [shape: f32[2,8,256], index: 3, kind: output, shape index: {}]  }
   0x1 LB: > { %s740_s13 = sadd.s32 4294967295, %s808_s12   ;;  %p744_p0 = scmp.ge.s32.totalorder %s808_s12, 1  ;;  %s808_s12 = sphi %s839_s12, %s13_s12  }
   0x2   : > { %p137_p1 = scmp.lt.s32.totalorder %s808_s12, 3 }
   0x4   : > { %p138_p2 = pnand %p744_p0, %p137_p1 }
   0x5   : > { %p161_p3 = scmp.lt.s32.totalorder (!%p138_p2), %s740_s13, 1  ;;  %v810_v0 = vmov (!%p138_p2), 0   ;;  %v675_v1 = vld [vmem:[%s920_s2] sm:$0xff] (!%p138_p2)  ;;  %vm189_vm0 = vcmask (!%p138_p2), 1045504   ;;  %vm185_vm1 = vcmask (!%p138_p2), 97280   ;;  %s811_s11 = smov (!%p138_p2), 127   ;;  %v241_v55 = vlaneseq (!%p138_p2) }
   0x6   : > { %141 = sbr.rel (%p138_p2) target bundleno = 394 (0x18a), region = 32  ;;  %228 = vmatprep.mubr.bf16.mxu0 (!%p138_p2), %v810_v0  ;;  %281 = vmatprep.mubr.bf16.mxu1 (!%p138_p2), %v810_v0  ;;  %v749_v5 = vld [vmem:[%s919_s1 + $0x4] sm:$0xf] (!%p138_p2)  ;;  %v174_v6 = vld [vmem:[%s919_s1] sm:$0xf] (!%p138_p2)  ;;  %s812_s14 = smov (!%p138_p2), 126  }
   0x7   : > { %798 = vset.pattern.permute.xlu0 (!%p138_p2), %v810_v0  ;;  %v756_v7 = vld [vmem:[%s919_s1 + $0x8] sm:$0xf] (!%p138_p2)  ;;  %v759_v8 = vld [vmem:[%s919_s1 + $0xc] sm:$0xf] (!%p138_p2)  ;;  %v762_v9 = vld [vmem:[%s919_s1 + $0x10] sm:$0xf] (!%p138_p2) }
   0x8   : > { %678 = vperm.xlu0 (!%p138_p2), %798, %v675_v1   ;;  %v765_v10 = vld [vmem:[%s919_s1 + $0x14] sm:$0xf] (!%p138_p2)  ;;  %v771_v11 = vld [vmem:[%s919_s1 + $0x1c] sm:$0xf] (!%p138_p2)  ;;  %v768_v12 = vld [vmem:[%s919_s1 + $0x18] sm:$0xf] (!%p138_p2) }
   0x9   : > { %v774_v13 = vld [vmem:[%s919_s1 + $0x20] sm:$0xf] (!%p138_p2)  ;;  %s813_s15 = smov (!%p138_p2), 112   ;;  %s814_s17 = smov (!%p138_p2), 111   ;;  %v242_v58 = vand.u32 (!%p138_p2), 127, %v241_v55 }
   0xa   : > { %s815_s18 = smov (!%p138_p2), 110   ;;  %s817_s20 = smov (!%p138_p2), 95  }
   0xb   : > { %s818_s21 = smov (!%p138_p2), 94   ;;  %vm243_vm2 = vcmp.lt.s32.totalorder (!%p138_p2), %v242_v58, 127  ;;  %vm340_vm3 = vcmp.lt.s32.totalorder (!%p138_p2), %v242_v58, 126  ;;  %vm395_vm4 = vcmp.lt.s32.totalorder (!%p138_p2), %v242_v58, 112  ;;  %vm450_vm5 = vcmp.lt.s32.totalorder (!%p138_p2), %v242_v58, 111 }
   0xc   : > { %vm505_vm6 = vcmp.lt.s32.totalorder (!%p138_p2), %v242_v58, 110  ;;  %vm560_vm7 = vcmp.lt.s32.totalorder (!%p138_p2), %v242_v58, 96  ;;  %vm615_vm8 = vcmp.lt.s32.totalorder (!%p138_p2), %v242_v58, 95  ;;  %vm670_vm9 = vcmp.lt.s32.totalorder (!%p138_p2), %v242_v58, 94 }
   0xd   : > { %s923_s13 = smov (!%p161_p3, %s740_s13), 1 }
   0xe   : > { %s779_s16 = sshll.u32 %s923_s13, 4 }
   0xf   : > { %s165_s19 = scalar_lea.vmem %s918_s0, %s779_s16  ;;  %s170_s24 = scalar_lea.vmem %s921_s3, %s779_s16 }
  0x10   : > { %v799_v2 = vld [vmem:[%s165_s19 + $0x4] ss:$8 sps:$4 sm:$0x3f]   ;;  %v801_v3 = vld [vmem:[%s165_s19] ss:$8 sps:$4 sm:$0x3f]  }
  0x11   : > { %752 = vmatprep.subr.msk.bf16.mxu0 %vm189_vm0, %v799_v2  ;;  %754 = vmatprep.subr.msk.bf16.mxu1 %vm189_vm0, %v799_v2  ;;  %v191_v4 = vsel %vm189_vm0, %v801_v3, 0  ;;  %s816_s19 = smov 96  }
  0x12   : > { %197 = vmatpush1.bf16.msra.mxu0 %v191_v4  ;;  %250 = vmatpush1.bf16.msra.mxu1 %v191_v4 }
  0x13   : > { %757 = vmatprep.subr.msk.bf16.mxu0 %vm189_vm0, %v799_v2  ;;  %760 = vmatprep.subr.msk.bf16.mxu1 %vm189_vm0, %v799_v2 }
  0x15   : > { %753 = vmatmul.mubr.msk.bf16.vlgmr.msra.gmra.mrb[0].mxu0 %vm185_vm1, %v749_v5  ;;  %755 = vmatmul.mubr.msk.bf16.vlgmr.msra.gmra.mrb[0].mxu1 %vm185_vm1, %v174_v6 }
  0x16   : > { %296 = vmatpush1.bf16.msra.mxu0 %v191_v4  ;;  %351 = vmatpush1.bf16.msra.mxu1 %v191_v4 }
  0x17   : > { %327 = vmatprep.mubr.bf16.mxu0 %v810_v0  ;;  %382 = vmatprep.mubr.bf16.mxu1 %v810_v0 }
  0x18   : > { %763 = vmatprep.subr.msk.bf16.mxu0 %vm189_vm0, %v799_v2  ;;  %766 = vmatprep.subr.msk.bf16.mxu1 %vm189_vm0, %v799_v2 }
  0x1d   : > { %758 = vmatmul.mubr.msk.bf16.vlgmr.msra.gmra.mrb[4].mxu0 %vm185_vm1, %v756_v7  ;;  %761 = vmatmul.mubr.msk.bf16.vlgmr.msra.gmra.mrb[4].mxu1 %vm185_vm1, %v759_v8 }
  0x1e   : > { %406 = vmatpush1.bf16.msra.mxu0 %v191_v4  ;;  %461 = vmatpush1.bf16.msra.mxu1 %v191_v4 }
  0x1f   : > { %437 = vmatprep.mubr.bf16.mxu0 %v810_v0  ;;  %492 = vmatprep.mubr.bf16.mxu1 %v810_v0 }
  0x20   : > { %772 = vmatprep.subr.msk.bf16.mxu1 %vm189_vm0, %v799_v2  ;;  %769 = vmatprep.subr.msk.bf16.mxu0 %vm189_vm0, %v799_v2 }
  0x25   : > { %764 = vmatmul.mubr.msk.bf16.vlgmr.msra.gmra.mrb[8].mxu0 %vm185_vm1, %v762_v9  ;;  %767 = vmatmul.mubr.msk.bf16.vlgmr.msra.gmra.mrb[8].mxu1 %vm185_vm1, %v765_v10 }
  0x26   : > { %571 = vmatpush1.bf16.msra.mxu1 %v191_v4  ;;  %516 = vmatpush1.bf16.msra.mxu0 %v191_v4 }
  0x27   : > { %602 = vmatprep.mubr.bf16.mxu1 %v810_v0  ;;  %547 = vmatprep.mubr.bf16.mxu0 %v810_v0 }
  0x28   : > { %775 = vmatprep.subr.msk.bf16.mxu0 %vm189_vm0, %v799_v2 }
  0x2d   : > { %773 = vmatmul.mubr.msk.bf16.vlgmr.msra.gmra.mrb[12].mxu1 %vm185_vm1, %v771_v11  ;;  %770 = vmatmul.mubr.msk.bf16.vlgmr.msra.gmra.mrb[12].mxu0 %vm185_vm1, %v768_v12 }
  0x2e   : > { %626 = vmatpush1.bf16.msra.mxu0 %v191_v4  ;;  %657 = vmatprep.mubr.bf16.mxu0 %v810_v0 }
  0x35   : > { %776 = vmatmul.mubr.msk.bf16.vlgmr.msra.gmra.mrb[16].mxu0 %vm185_vm1, %v774_v13 }
  0x87   : > { %v679_v50 = vpop.permute.xlu0 %678 }
  0xe8   : > { %v230_v14 = vpop.f32.mrb[0].mxu0  ;;  %v904_v15 = vpop.f32.mrb[0].mxu1 }
  0xe9   : > { %237 = vrot.lane.b32.xlu0 %v230_v14, %s811_s11  ;;  %v232_v16 = vpop.f32.mrb[1].mxu0  ;;  %v906_v17 = vpop.f32.mrb[1].mxu1 }
  0xea   : > { %v234_v18 = vpop.f32.mrb[2].mxu0  ;;  %v287_v19 = vpop.f32.mrb[2].mxu1 }
  0xeb   : > { %v235_v20 = vpop.f32.mrb[3].mxu0  ;;  %v288_v21 = vpop.f32.mrb[3].mxu1 }
  0xed   : > { %239 = vrot.lane.b32.xlu0 %v232_v16, %s811_s11 }
  0xf0   : > { %v329_v22 = vpop.f32.mrb[4].mxu0  ;;  %v384_v23 = vpop.f32.mrb[4].mxu1 }
  0xf1   : > { %336 = vrot.lane.b32.xlu1 %v329_v22, %s812_s14  ;;  %v331_v24 = vpop.f32.mrb[5].mxu0  ;;  %v386_v25 = vpop.f32.mrb[5].mxu1  ;;  %391 = vrot.lane.b32.xlu0 %v384_v23, %s813_s15 }
  0xf2   : > { %v333_v26 = vpop.f32.mrb[6].mxu0  ;;  %v388_v27 = vpop.f32.mrb[6].mxu1 }
  0xf3   : > { %v334_v28 = vpop.f32.mrb[7].mxu0  ;;  %v389_v29 = vpop.f32.mrb[7].mxu1 }
  0xf5   : > { %338 = vrot.lane.b32.xlu1 %v331_v24, %s812_s14 }
  0xf8   : > { %v439_v30 = vpop.f32.mrb[8].mxu0  ;;  %v494_v31 = vpop.f32.mrb[8].mxu1 }
  0xf9   : > { %393 = vrot.lane.b32.xlu1 %v386_v25, %s813_s15  ;;  %446 = vrot.lane.b32.xlu0 %v439_v30, %s814_s17  ;;  %v441_v32 = vpop.f32.mrb[9].mxu0  ;;  %v496_v33 = vpop.f32.mrb[9].mxu1 }
  0xfa   : > { %v443_v34 = vpop.f32.mrb[10].mxu0  ;;  %v498_v35 = vpop.f32.mrb[10].mxu1 }
  0xfb   : > { %v444_v36 = vpop.f32.mrb[11].mxu0  ;;  %v499_v37 = vpop.f32.mrb[11].mxu1 }
  0xfd   : > { %448 = vrot.lane.b32.xlu1 %v441_v32, %s814_s17  ;;  %501 = vrot.lane.b32.xlu0 %v494_v31, %s815_s18 }
 0x100   : > { %v604_v38 = vpop.f32.mrb[12].mxu1  ;;  %v549_v39 = vpop.f32.mrb[12].mxu0 }
 0x101   : > { %503 = vrot.lane.b32.xlu1 %v496_v33, %s815_s18  ;;  %v606_v40 = vpop.f32.mrb[13].mxu1  ;;  %v551_v41 = vpop.f32.mrb[13].mxu0  ;;  %556 = vrot.lane.b32.xlu0 %v549_v39, %s816_s19 }
 0x102   : > { %v608_v42 = vpop.f32.mrb[14].mxu1  ;;  %v553_v43 = vpop.f32.mrb[14].mxu0 }
 0x103   : > { %v609_v44 = vpop.f32.mrb[15].mxu1  ;;  %v554_v45 = vpop.f32.mrb[15].mxu0 }
 0x105   : > { %611 = vrot.lane.b32.xlu1 %v604_v38, %s817_s20 }
 0x108   : > { %v659_v46 = vpop.f32.mrb[16].mxu0 }
 0x109   : > { %558 = vrot.lane.b32.xlu1 %v551_v41, %s816_s19  ;;  %v661_v47 = vpop.f32.mrb[17].mxu0  ;;  %666 = vrot.lane.b32.xlu0 %v659_v46, %s818_s21 }
 0x10a   : > { %v663_v48 = vpop.f32.mrb[18].mxu0 }
 0x10b   : > { %v664_v49 = vpop.f32.mrb[19].mxu0 }
 0x10d   : > { %613 = vrot.lane.b32.xlu1 %v606_v40, %s817_s20 }
 0x111   : > { %668 = vrot.lane.b32.xlu1 %v661_v47, %s818_s21 }
 0x15b   : > { %v238_v51 = vpop.permute.xlu0 %237 }
 0x15f   : > { %v240_v53 = vpop.permute.xlu0 %239 }
 0x160   : > { %v244_v62 = vsel %vm243_vm2, %v238_v51, %v240_v53  ;;  %v245_v63 = vsel %vm243_vm2, %v240_v53, %v238_v51 }
 0x161   : > { %v284_v2 = vadd.f32 %v904_v15, %v244_v62  ;;  %v286_v3 = vadd.f32 %v906_v17, %v245_v63 }
 0x163   : > { %v337_v52 = vpop.permute.xlu1 %336  ;;  %v392_v56 = vpop.permute.xlu0 %391 }
 0x167   : > { %v339_v54 = vpop.permute.xlu1 %338 }
 0x168   : > { %v341_v0 = vsel %vm340_vm3, %v337_v52, %v339_v54  ;;  %v342_v1 = vsel %vm340_vm3, %v339_v54, %v337_v52 }
 0x169   : > { %v343_v8 = vadd.f32 %v341_v0, %v284_v2  ;;  %v344_v9 = vadd.f32 %v342_v1, %v286_v3 }
 0x16b   : > { %v394_v57 = vpop.permute.xlu1 %393  ;;  %v447_v60 = vpop.permute.xlu0 %446 }
 0x16c   : > { %v396_v6 = vsel %vm395_vm4, %v392_v56, %v394_v57  ;;  %v397_v7 = vsel %vm395_vm4, %v394_v57, %v392_v56 }
 0x16d   : > { %v398_v12 = vadd.f32 %v396_v6, %v343_v8  ;;  %v399_v13 = vadd.f32 %v397_v7, %v344_v9 }
 0x16f   : > { %v449_v59 = vpop.permute.xlu1 %448  ;;  %v502_v4 = vpop.permute.xlu0 %501 }
 0x170   : > { %v451_v10 = vsel %vm450_vm5, %v447_v60, %v449_v59  ;;  %v452_v11 = vsel %vm450_vm5, %v449_v59, %v447_v60 }
 0x171   : > { %v453_v15 = vadd.f32 %v451_v10, %v398_v12  ;;  %v454_v20 = vadd.f32 %v452_v11, %v399_v13 }
 0x173   : > { %v504_v61 = vpop.permute.xlu1 %503  ;;  %v557_v14 = vpop.permute.xlu0 %556 }
 0x174   : > { %v506_v18 = vsel %vm505_vm6, %v502_v4, %v504_v61  ;;  %v507_v19 = vsel %vm505_vm6, %v504_v61, %v502_v4 }
 0x175   : > { %v508_v22 = vadd.f32 %v506_v18, %v453_v15  ;;  %v509_v23 = vadd.f32 %v507_v19, %v454_v20 }
 0x177   : > { %v612_v5 = vpop.permute.xlu1 %611 }
 0x17b   : > { %v559_v16 = vpop.permute.xlu1 %558  ;;  %v667_v29 = vpop.permute.xlu0 %666 }
 0x17c   : > { %v561_v17 = vsel %vm560_vm7, %v557_v14, %v559_v16  ;;  %v562_v21 = vsel %vm560_vm7, %v559_v16, %v557_v14 }
 0x17d   : > { %v563_v27 = vadd.f32 %v561_v17, %v508_v22  ;;  %v564_v28 = vadd.f32 %v562_v21, %v509_v23 }
 0x17f   : > { %v614_v24 = vpop.permute.xlu1 %613 }
 0x180   : > { %v616_v25 = vsel %vm615_vm8, %v612_v5, %v614_v24  ;;  %v617_v26 = vsel %vm615_vm8, %v614_v24, %v612_v5 }
 0x181   : > { %v618_v30 = vadd.f32 %v616_v25, %v563_v27  ;;  %v619_v31 = vadd.f32 %v617_v26, %v564_v28 }
 0x183   : > { %v669_v32 = vpop.permute.xlu1 %668 }
 0x184   : > { %v671_v33 = vsel %vm670_vm9, %v667_v29, %v669_v32  ;;  %v672_v34 = vsel %vm670_vm9, %v669_v32, %v667_v29 }
 0x185   : > { %v673_v35 = vadd.f32 %v671_v33, %v618_v30  ;;  %v674_v36 = vadd.f32 %v672_v34, %v619_v31 }
 0x187   : > { %v681_v37 = vadd.f32 %v679_v50, %v673_v35  ;;  %v682_v38 = vadd.f32 %v679_v50, %v674_v36 }
 0x189   : > { %683 = vst [vmem:[%s170_s24] sm:$0xff] %v681_v37  ;;  %684 = vst [vmem:[%s170_s24 + $0x8] sm:$0xff] %v682_v38 }
 0x18a PF: > { %s13_s12 = sadd.s32 1, %s808_s12  }
 0x18b   : > { %p10_p4 = scmp.ge.s32.totalorder %s13_s12, 4  }
 0x18d   :  { %12 = sbr.rel (!%p10_p4) target bundleno = 1 (0x1), region = 70 }

</bundles_post_ra>
